<compile_context>
chip_gen: v6e
topology: v6e:2x2x1
jax: 0.10.0
libtpu: 0.0.40
codegen_flags: <defaults>
</compile_context>

<pallas_src>
import functools

import jax
import jax.numpy as jnp
from jax import lax
from jax.experimental import pallas as pl
from jax.experimental.pallas import tpu as pltpu

LANE = 128
SUBLANE = 8


def _round_up(n, m):
    return (n + m - 1) // m * m


def _uniform_int31(shape, seed, row0, salt):
    """Stateless hash -> int32 uniform in [0, 2^31). Plain int32 elementwise ops only."""
    rows = lax.broadcasted_iota(jnp.int32, shape, 0) + row0
    cols = lax.broadcasted_iota(jnp.int32, shape, 1)
    h = rows * jnp.int32(0x01000193) + cols * jnp.int32(0x0019660D)
    h = h + seed * jnp.int32(0x27D4EB2F) + jnp.int32(salt) * jnp.int32(0x3504F333)
    # low-bias 32-bit finalizer; logical >>16 emulated as arithmetic >>16 masked to 16 bits
    h = (((h >> 16) & 0xFFFF) ^ h) * jnp.int32(0x045D9F3B)
    h = (((h >> 16) & 0xFFFF) ^ h) * jnp.int32(0x045D9F3B)
    h = ((h >> 16) & 0xFFFF) ^ h
    return h & 0x7FFFFFFF


def _dropout_mask(v, seed, row0, salt, p):
    """Zero out elements with probability p. The 1/(1-p) scale is folded into the
    downstream weight matrix in pack_params, so only a select is done here."""
    r = _uniform_int31(v.shape, seed, row0, salt)
    thresh = jnp.int32(int(round(p * (1 << 31))))
    return jnp.where(r >= thresh, v, jnp.float32(0.0))


def ffnn_kernel(seed_ref,
                x_ref, w1_ref, b1_ref, w2_ref, b2_ref, w3_ref, b3_ref,
                out_ref, *, dropout_p, block_rows):
    seed = seed_ref[0]
    row0 = pl.program_id(0) * block_rows  # decorrelates dropout masks across tiles

    # dropout -> fc1 -> ReLU
    x = x_ref[...]
    if dropout_p > 0.0:
        x = _dropout_mask(x, seed, row0, 1, dropout_p)
    h = jnp.dot(x.astype(w1_ref.dtype), w1_ref[...],
                preferred_element_type=jnp.float32) + b1_ref[...]
    h = jnp.maximum(h, 0.0)

    # dropout -> fc2 -> ReLU
    if dropout_p > 0.0:
        h = _dropout_mask(h, seed, row0, 2, dropout_p)
    h = jnp.dot(h.astype(w2_ref.dtype), w2_ref[...],
                preferred_element_type=jnp.float32) + b2_ref[...]
    h = jnp.maximum(h, 0.0)

    # dropout -> fc3
    if dropout_p > 0.0:
        h = _dropout_mask(h, seed, row0, 3, dropout_p)
    out = jnp.dot(h.astype(w3_ref.dtype), w3_ref[...],
                  preferred_element_type=jnp.float32) + b3_ref[...]
    out_ref[...] = out.astype(out_ref.dtype)


def init_params(key, input_dim, n_units1, n_units2, output_dim):
    """Synthetic params in PyTorch nn.Linear layout: w [out, in], b [out]."""
    k1, k2, k3, k4, k5, k6 = jax.random.split(key, 6)

    def linear(kw, kb, fan_in, fan_out):
        bound = 1.0 / float(fan_in) ** 0.5
        w = jax.random.uniform(kw, (fan_out, fan_in), jnp.float32, -bound, bound)
        b = jax.random.uniform(kb, (fan_out,), jnp.float32, -bound, bound)
        return w, b

    w1, b1 = linear(k1, k2, input_dim, n_units1)
    w2, b2 = linear(k3, k4, n_units1, n_units2)
    w3, b3 = linear(k5, k6, n_units2, output_dim)
    return {"w1": w1, "b1": b1, "w2": w2, "b2": b2, "w3": w3, "b3": b3}


def pack_params(params, dropout_p, compute_dtype=jnp.bfloat16):
    """Transpose to [in, out], pad feature dims to 128, fold 1/(1-p) into weights,
    cast weights to the MXU compute dtype (biases stay f32)."""
    inv_keep = 1.0 / (1.0 - dropout_p) if dropout_p > 0.0 else 1.0

    def pack(w, b):
        out_d, in_d = w.shape
        in_p, out_p = _round_up(in_d, LANE), _round_up(out_d, LANE)
        wt = jnp.zeros((in_p, out_p), jnp.float32).at[:in_d, :out_d].set(w.T * inv_keep)
        bt = jnp.zeros((1, out_p), jnp.float32).at[:, :out_d].set(b[None, :])
        return wt.astype(compute_dtype), bt

    w1, b1 = pack(params["w1"], params["b1"])
    w2, b2 = pack(params["w2"], params["b2"])
    w3, b3 = pack(params["w3"], params["b3"])
    return (w1, b1, w2, b2, w3, b3)


def ffnn_forward(x, packed, seed, dropout_p, out_dim, block_rows=512):
    """x: [batch, input_dim] float32. Returns [batch, out_dim] float32."""
    w1, b1, w2, b2, w3, b3 = packed
    batch, in_dim = x.shape
    din_p = w1.shape[0]
    dout_p = w3.shape[1]

    tb = min(block_rows, _round_up(batch, SUBLANE))
    batch_p = _round_up(batch, tb)
    xp = jnp.zeros((batch_p, din_p), jnp.float32).at[:batch, :in_dim].set(x)

    kernel = functools.partial(ffnn_kernel, dropout_p=float(dropout_p), block_rows=tb)
    seed_arr = jnp.asarray([seed], dtype=jnp.int32)

    out = pl.pallas_call(
        kernel,
        out_shape=jax.ShapeDtypeStruct((batch_p, dout_p), jnp.float32),
        grid_spec=pltpu.PrefetchScalarGridSpec(
            num_scalar_prefetch=1,
            grid=(batch_p // tb,),
            in_specs=[
                pl.BlockSpec((tb, din_p), lambda i, s: (i, 0)),   # x tile (streamed)
                pl.BlockSpec(w1.shape, lambda i, s: (0, 0)),      # weights stay resident
                pl.BlockSpec(b1.shape, lambda i, s: (0, 0)),
                pl.BlockSpec(w2.shape, lambda i, s: (0, 0)),
                pl.BlockSpec(b2.shape, lambda i, s: (0, 0)),
                pl.BlockSpec(w3.shape, lambda i, s: (0, 0)),
                pl.BlockSpec(b3.shape, lambda i, s: (0, 0)),
            ],
            out_specs=pl.BlockSpec((tb, dout_p), lambda i, s: (i, 0)),
        ),
        compiler_params=pltpu.CompilerParams(
            dimension_semantics=("parallel",)),
    )(seed_arr, xp, w1, b1, w2, b2, w3, b3)

    return out[:batch, :out_dim]


if __name__ == "__main__":
    # FFNN(input_dim=32, output_dim=16, n_units1=64, n_units2=64,
    #      dropout_fraction=0.2, activ="ReLU")
    batch, input_dim, n_units1, n_units2, output_dim = 16, 32, 64, 64, 16
    dropout_p = 0.2

    key = jax.random.PRNGKey(0)
    kx, kp = jax.random.split(key)
    x = jax.random.normal(kx, (batch, input_dim), dtype=jnp.float32)
    params = init_params(kp, input_dim, n_units1, n_units2, output_dim)

    # Training-mode forward (dropout active).
    packed = pack_params(params, dropout_p)
    out = ffnn_forward(x, packed, seed=1234, dropout_p=dropout_p, out_dim=output_dim)
    out = jax.block_until_ready(out)
    assert out.shape == (batch, output_dim)
    assert bool(jnp.all(jnp.isfinite(out)))

    # p = 0 path checked against a pure-JAX reference (bf16-matmul tolerance).
    packed0 = pack_params(params, 0.0)
    out0 = ffnn_forward(x, packed0, seed=0, dropout_p=0.0, out_dim=output_dim)
    ref = jnp.maximum(x @ params["w1"].T + params["b1"], 0.0)
    ref = jnp.maximum(ref @ params["w2"].T + params["b2"], 0.0)
    ref = ref @ params["w3"].T + params["b3"]
    assert bool(jnp.allclose(out0, ref, atol=5e-2, rtol=5e-2))

    print("KERNEL_OK")
</pallas_src>

<mosaic_0001>
module attributes {stable_mosaic.version = 11 : i64} {
  func.func @ffnn_kernel(%arg0: i32, %arg1: memref<1xi32, #tpu.memory_space<smem>>, %arg2: memref<16x128xf32, #tpu.memory_space<vmem>>, %arg3: memref<128x128xbf16, #tpu.memory_space<vmem>>, %arg4: memref<1x128xf32, #tpu.memory_space<vmem>>, %arg5: memref<128x128xbf16, #tpu.memory_space<vmem>>, %arg6: memref<1x128xf32, #tpu.memory_space<vmem>>, %arg7: memref<128x128xbf16, #tpu.memory_space<vmem>>, %arg8: memref<1x128xf32, #tpu.memory_space<vmem>>, %arg9: memref<16x128xf32, #tpu.memory_space<vmem>>) attributes {dimension_semantics = [#tpu.dimension_semantics<parallel>], iteration_bounds = array<i64: 1>, scalar_prefetch = 1 : i64, scratch_operands = 0 : i64, tpu.core_type = #tpu.core_type<tc>, window_params = [{transform_indices = @transform_0, window_bounds = array<i64: 16, 128>}, {pipeline_mode = #tpu.pipeline_mode<synchronous>, transform_indices = @transform_1, window_bounds = array<i64: 128, 128>}, {pipeline_mode = #tpu.pipeline_mode<synchronous>, transform_indices = @transform_2, window_bounds = array<i64: 1, 128>}, {pipeline_mode = #tpu.pipeline_mode<synchronous>, transform_indices = @transform_3, window_bounds = array<i64: 128, 128>}, {pipeline_mode = #tpu.pipeline_mode<synchronous>, transform_indices = @transform_4, window_bounds = array<i64: 1, 128>}, {pipeline_mode = #tpu.pipeline_mode<synchronous>, transform_indices = @transform_5, window_bounds = array<i64: 128, 128>}, {pipeline_mode = #tpu.pipeline_mode<synchronous>, transform_indices = @transform_6, window_bounds = array<i64: 1, 128>}, {transform_indices = @transform_7, window_bounds = array<i64: 16, 128>}]} {
    %c0 = arith.constant 0 : index
    %0 = memref.load %arg1[%c0] : memref<1xi32, #tpu.memory_space<smem>>
    %c16_i32 = arith.constant 16 : i32
    %1 = arith.muli %arg0, %c16_i32 : i32
    %c0_0 = arith.constant 0 : index
    %c0_1 = arith.constant 0 : index
    %2 = vector.load %arg2[%c0_0, %c0_1] : memref<16x128xf32, #tpu.memory_space<vmem>>, vector<16x128xf32>
    %3 = tpu.iota {dimensions = array<i32: 0>} : vector<16x128xi32>
    %4 = vector.broadcast %1 : i32 to vector<16x128xi32>
    %5 = arith.addi %3, %4 : vector<16x128xi32>
    %6 = tpu.iota {dimensions = array<i32: 1>} : vector<16x128xi32>
    %c16777619_i32 = arith.constant 16777619 : i32
    %7 = vector.broadcast %c16777619_i32 : i32 to vector<16x128xi32>
    %8 = arith.muli %5, %7 : vector<16x128xi32>
    %c1664525_i32 = arith.constant 1664525 : i32
    %9 = vector.broadcast %c1664525_i32 : i32 to vector<16x128xi32>
    %10 = arith.muli %6, %9 : vector<16x128xi32>
    %11 = arith.addi %8, %10 : vector<16x128xi32>
    %c668265263_i32 = arith.constant 668265263 : i32
    %12 = arith.muli %0, %c668265263_i32 : i32
    %13 = vector.broadcast %12 : i32 to vector<16x128xi32>
    %14 = arith.addi %11, %13 : vector<16x128xi32>
    %c1_i32 = arith.constant 1 : i32
    %c889516851_i32 = arith.constant 889516851 : i32
    %15 = arith.muli %c1_i32, %c889516851_i32 : i32
    %16 = vector.broadcast %15 : i32 to vector<16x128xi32>
    %17 = arith.addi %14, %16 : vector<16x128xi32>
    %c16_i32_2 = arith.constant 16 : i32
    %18 = vector.broadcast %c16_i32_2 : i32 to vector<16x128xi32>
    %19 = arith.shrsi %17, %18 : vector<16x128xi32>
    %c65535_i32 = arith.constant 65535 : i32
    %20 = vector.broadcast %c65535_i32 : i32 to vector<16x128xi32>
    %21 = arith.andi %19, %20 : vector<16x128xi32>
    %22 = arith.xori %21, %17 : vector<16x128xi32>
    %c73244475_i32 = arith.constant 73244475 : i32
    %23 = vector.broadcast %c73244475_i32 : i32 to vector<16x128xi32>
    %24 = arith.muli %22, %23 : vector<16x128xi32>
    %c16_i32_3 = arith.constant 16 : i32
    %25 = vector.broadcast %c16_i32_3 : i32 to vector<16x128xi32>
    %26 = arith.shrsi %24, %25 : vector<16x128xi32>
    %c65535_i32_4 = arith.constant 65535 : i32
    %27 = vector.broadcast %c65535_i32_4 : i32 to vector<16x128xi32>
    %28 = arith.andi %26, %27 : vector<16x128xi32>
    %29 = arith.xori %28, %24 : vector<16x128xi32>
    %c73244475_i32_5 = arith.constant 73244475 : i32
    %30 = vector.broadcast %c73244475_i32_5 : i32 to vector<16x128xi32>
    %31 = arith.muli %29, %30 : vector<16x128xi32>
    %c16_i32_6 = arith.constant 16 : i32
    %32 = vector.broadcast %c16_i32_6 : i32 to vector<16x128xi32>
    %33 = arith.shrsi %31, %32 : vector<16x128xi32>
    %c65535_i32_7 = arith.constant 65535 : i32
    %34 = vector.broadcast %c65535_i32_7 : i32 to vector<16x128xi32>
    %35 = arith.andi %33, %34 : vector<16x128xi32>
    %36 = arith.xori %35, %31 : vector<16x128xi32>
    %c2147483647_i32 = arith.constant 2147483647 : i32
    %37 = vector.broadcast %c2147483647_i32 : i32 to vector<16x128xi32>
    %38 = arith.andi %36, %37 : vector<16x128xi32>
    %c429496730_i32 = arith.constant 429496730 : i32
    %39 = vector.broadcast %c429496730_i32 : i32 to vector<16x128xi32>
    %40 = arith.cmpi sge, %38, %39 : vector<16x128xi32>
    %cst = arith.constant 0.000000e+00 : f32
    %41 = vector.broadcast %cst : f32 to vector<16x128xf32>
    %42 = arith.select %40, %2, %41 : vector<16x128xi1>, vector<16x128xf32>
    %43 = arith.truncf %42 : vector<16x128xf32> to vector<16x128xbf16>
    %c0_8 = arith.constant 0 : index
    %c0_9 = arith.constant 0 : index
    %44 = vector.load %arg3[%c0_8, %c0_9] : memref<128x128xbf16, #tpu.memory_space<vmem>>, vector<128x128xbf16>
    %cst_10 = arith.constant dense<0.000000e+00> : vector<16x128xf32>
    %45 = tpu.matmul %43, %44, %cst_10 {dimension_numbers = #tpu.dot_dimension_numbers<[1], [0], [0], [1], [0, 0, 1, 1], [], []>} : vector<16x128xbf16>, vector<128x128xbf16>, vector<16x128xf32> -> vector<16x128xf32>
    %c0_11 = arith.constant 0 : index
    %c0_12 = arith.constant 0 : index
    %46 = vector.load %arg4[%c0_11, %c0_12] : memref<1x128xf32, #tpu.memory_space<vmem>>, vector<1x128xf32>
    %47 = vector.broadcast %46 : vector<1x128xf32> to vector<16x128xf32>
    %48 = arith.addf %45, %47 : vector<16x128xf32>
    %cst_13 = arith.constant 0.000000e+00 : f32
    %49 = vector.broadcast %cst_13 : f32 to vector<16x128xf32>
    %50 = arith.maximumf %48, %49 : vector<16x128xf32>
    %51 = tpu.iota {dimensions = array<i32: 0>} : vector<16x128xi32>
    %52 = vector.broadcast %1 : i32 to vector<16x128xi32>
    %53 = arith.addi %51, %52 : vector<16x128xi32>
    %54 = tpu.iota {dimensions = array<i32: 1>} : vector<16x128xi32>
    %c16777619_i32_14 = arith.constant 16777619 : i32
    %55 = vector.broadcast %c16777619_i32_14 : i32 to vector<16x128xi32>
    %56 = arith.muli %53, %55 : vector<16x128xi32>
    %c1664525_i32_15 = arith.constant 1664525 : i32
    %57 = vector.broadcast %c1664525_i32_15 : i32 to vector<16x128xi32>
    %58 = arith.muli %54, %57 : vector<16x128xi32>
    %59 = arith.addi %56, %58 : vector<16x128xi32>
    %c668265263_i32_16 = arith.constant 668265263 : i32
    %60 = arith.muli %0, %c668265263_i32_16 : i32
    %61 = vector.broadcast %60 : i32 to vector<16x128xi32>
    %62 = arith.addi %59, %61 : vector<16x128xi32>
    %c2_i32 = arith.constant 2 : i32
    %c889516851_i32_17 = arith.constant 889516851 : i32
    %63 = arith.muli %c2_i32, %c889516851_i32_17 : i32
    %64 = vector.broadcast %63 : i32 to vector<16x128xi32>
    %65 = arith.addi %62, %64 : vector<16x128xi32>
    %c16_i32_18 = arith.constant 16 : i32
    %66 = vector.broadcast %c16_i32_18 : i32 to vector<16x128xi32>
    %67 = arith.shrsi %65, %66 : vector<16x128xi32>
    %c65535_i32_19 = arith.constant 65535 : i32
    %68 = vector.broadcast %c65535_i32_19 : i32 to vector<16x128xi32>
    %69 = arith.andi %67, %68 : vector<16x128xi32>
    %70 = arith.xori %69, %65 : vector<16x128xi32>
    %c73244475_i32_20 = arith.constant 73244475 : i32
    %71 = vector.broadcast %c73244475_i32_20 : i32 to vector<16x128xi32>
    %72 = arith.muli %70, %71 : vector<16x128xi32>
    %c16_i32_21 = arith.constant 16 : i32
    %73 = vector.broadcast %c16_i32_21 : i32 to vector<16x128xi32>
    %74 = arith.shrsi %72, %73 : vector<16x128xi32>
    %c65535_i32_22 = arith.constant 65535 : i32
    %75 = vector.broadcast %c65535_i32_22 : i32 to vector<16x128xi32>
    %76 = arith.andi %74, %75 : vector<16x128xi32>
    %77 = arith.xori %76, %72 : vector<16x128xi32>
    %c73244475_i32_23 = arith.constant 73244475 : i32
    %78 = vector.broadcast %c73244475_i32_23 : i32 to vector<16x128xi32>
    %79 = arith.muli %77, %78 : vector<16x128xi32>
    %c16_i32_24 = arith.constant 16 : i32
    %80 = vector.broadcast %c16_i32_24 : i32 to vector<16x128xi32>
    %81 = arith.shrsi %79, %80 : vector<16x128xi32>
    %c65535_i32_25 = arith.constant 65535 : i32
    %82 = vector.broadcast %c65535_i32_25 : i32 to vector<16x128xi32>
    %83 = arith.andi %81, %82 : vector<16x128xi32>
    %84 = arith.xori %83, %79 : vector<16x128xi32>
    %c2147483647_i32_26 = arith.constant 2147483647 : i32
    %85 = vector.broadcast %c2147483647_i32_26 : i32 to vector<16x128xi32>
    %86 = arith.andi %84, %85 : vector<16x128xi32>
    %c429496730_i32_27 = arith.constant 429496730 : i32
    %87 = vector.broadcast %c429496730_i32_27 : i32 to vector<16x128xi32>
    %88 = arith.cmpi sge, %86, %87 : vector<16x128xi32>
    %cst_28 = arith.constant 0.000000e+00 : f32
    %89 = vector.broadcast %cst_28 : f32 to vector<16x128xf32>
    %90 = arith.select %88, %50, %89 : vector<16x128xi1>, vector<16x128xf32>
    %91 = arith.truncf %90 : vector<16x128xf32> to vector<16x128xbf16>
    %c0_29 = arith.constant 0 : index
    %c0_30 = arith.constant 0 : index
    %92 = vector.load %arg5[%c0_29, %c0_30] : memref<128x128xbf16, #tpu.memory_space<vmem>>, vector<128x128xbf16>
    %cst_31 = arith.constant dense<0.000000e+00> : vector<16x128xf32>
    %93 = tpu.matmul %91, %92, %cst_31 {dimension_numbers = #tpu.dot_dimension_numbers<[1], [0], [0], [1], [0, 0, 1, 1], [], []>} : vector<16x128xbf16>, vector<128x128xbf16>, vector<16x128xf32> -> vector<16x128xf32>
    %c0_32 = arith.constant 0 : index
    %c0_33 = arith.constant 0 : index
    %94 = vector.load %arg6[%c0_32, %c0_33] : memref<1x128xf32, #tpu.memory_space<vmem>>, vector<1x128xf32>
    %95 = vector.broadcast %94 : vector<1x128xf32> to vector<16x128xf32>
    %96 = arith.addf %93, %95 : vector<16x128xf32>
    %cst_34 = arith.constant 0.000000e+00 : f32
    %97 = vector.broadcast %cst_34 : f32 to vector<16x128xf32>
    %98 = arith.maximumf %96, %97 : vector<16x128xf32>
    %99 = tpu.iota {dimensions = array<i32: 0>} : vector<16x128xi32>
    %100 = vector.broadcast %1 : i32 to vector<16x128xi32>
    %101 = arith.addi %99, %100 : vector<16x128xi32>
    %102 = tpu.iota {dimensions = array<i32: 1>} : vector<16x128xi32>
    %c16777619_i32_35 = arith.constant 16777619 : i32
    %103 = vector.broadcast %c16777619_i32_35 : i32 to vector<16x128xi32>
    %104 = arith.muli %101, %103 : vector<16x128xi32>
    %c1664525_i32_36 = arith.constant 1664525 : i32
    %105 = vector.broadcast %c1664525_i32_36 : i32 to vector<16x128xi32>
    %106 = arith.muli %102, %105 : vector<16x128xi32>
    %107 = arith.addi %104, %106 : vector<16x128xi32>
    %c668265263_i32_37 = arith.constant 668265263 : i32
    %108 = arith.muli %0, %c668265263_i32_37 : i32
    %109 = vector.broadcast %108 : i32 to vector<16x128xi32>
    %110 = arith.addi %107, %109 : vector<16x128xi32>
    %c3_i32 = arith.constant 3 : i32
    %c889516851_i32_38 = arith.constant 889516851 : i32
    %111 = arith.muli %c3_i32, %c889516851_i32_38 : i32
    %112 = vector.broadcast %111 : i32 to vector<16x128xi32>
    %113 = arith.addi %110, %112 : vector<16x128xi32>
    %c16_i32_39 = arith.constant 16 : i32
    %114 = vector.broadcast %c16_i32_39 : i32 to vector<16x128xi32>
    %115 = arith.shrsi %113, %114 : vector<16x128xi32>
    %c65535_i32_40 = arith.constant 65535 : i32
    %116 = vector.broadcast %c65535_i32_40 : i32 to vector<16x128xi32>
    %117 = arith.andi %115, %116 : vector<16x128xi32>
    %118 = arith.xori %117, %113 : vector<16x128xi32>
    %c73244475_i32_41 = arith.constant 73244475 : i32
    %119 = vector.broadcast %c73244475_i32_41 : i32 to vector<16x128xi32>
    %120 = arith.muli %118, %119 : vector<16x128xi32>
    %c16_i32_42 = arith.constant 16 : i32
    %121 = vector.broadcast %c16_i32_42 : i32 to vector<16x128xi32>
    %122 = arith.shrsi %120, %121 : vector<16x128xi32>
    %c65535_i32_43 = arith.constant 65535 : i32
    %123 = vector.broadcast %c65535_i32_43 : i32 to vector<16x128xi32>
    %124 = arith.andi %122, %123 : vector<16x128xi32>
    %125 = arith.xori %124, %120 : vector<16x128xi32>
    %c73244475_i32_44 = arith.constant 73244475 : i32
    %126 = vector.broadcast %c73244475_i32_44 : i32 to vector<16x128xi32>
    %127 = arith.muli %125, %126 : vector<16x128xi32>
    %c16_i32_45 = arith.constant 16 : i32
    %128 = vector.broadcast %c16_i32_45 : i32 to vector<16x128xi32>
    %129 = arith.shrsi %127, %128 : vector<16x128xi32>
    %c65535_i32_46 = arith.constant 65535 : i32
    %130 = vector.broadcast %c65535_i32_46 : i32 to vector<16x128xi32>
    %131 = arith.andi %129, %130 : vector<16x128xi32>
    %132 = arith.xori %131, %127 : vector<16x128xi32>
    %c2147483647_i32_47 = arith.constant 2147483647 : i32
    %133 = vector.broadcast %c2147483647_i32_47 : i32 to vector<16x128xi32>
    %134 = arith.andi %132, %133 : vector<16x128xi32>
    %c429496730_i32_48 = arith.constant 429496730 : i32
    %135 = vector.broadcast %c429496730_i32_48 : i32 to vector<16x128xi32>
    %136 = arith.cmpi sge, %134, %135 : vector<16x128xi32>
    %cst_49 = arith.constant 0.000000e+00 : f32
    %137 = vector.broadcast %cst_49 : f32 to vector<16x128xf32>
    %138 = arith.select %136, %98, %137 : vector<16x128xi1>, vector<16x128xf32>
    %139 = arith.truncf %138 : vector<16x128xf32> to vector<16x128xbf16>
    %c0_50 = arith.constant 0 : index
    %c0_51 = arith.constant 0 : index
    %140 = vector.load %arg7[%c0_50, %c0_51] : memref<128x128xbf16, #tpu.memory_space<vmem>>, vector<128x128xbf16>
    %cst_52 = arith.constant dense<0.000000e+00> : vector<16x128xf32>
    %141 = tpu.matmul %139, %140, %cst_52 {dimension_numbers = #tpu.dot_dimension_numbers<[1], [0], [0], [1], [0, 0, 1, 1], [], []>} : vector<16x128xbf16>, vector<128x128xbf16>, vector<16x128xf32> -> vector<16x128xf32>
    %c0_53 = arith.constant 0 : index
    %c0_54 = arith.constant 0 : index
    %142 = vector.load %arg8[%c0_53, %c0_54] : memref<1x128xf32, #tpu.memory_space<vmem>>, vector<1x128xf32>
    %143 = vector.broadcast %142 : vector<1x128xf32> to vector<16x128xf32>
    %144 = arith.addf %141, %143 : vector<16x128xf32>
    %c0_55 = arith.constant 0 : index
    %c0_56 = arith.constant 0 : index
    %145 = vector.load %arg9[%c0_55, %c0_56] : memref<16x128xf32, #tpu.memory_space<vmem>>, vector<16x128xf32>
    tpu.vector_store %arg9[%c0_55, %c0_56], %144 {strides = array<i32>} : memref<16x128xf32, #tpu.memory_space<vmem>>, vector<16x128xf32>,
    return
  }
  func.func @transform_0(%arg0: i32, %arg1: memref<1xi32, #tpu.memory_space<smem>>) -> (i32, i32) {
    %c0_i32 = arith.constant 0 : i32
    %c0_i32_0 = arith.constant 0 : i32
    return %arg0, %c0_i32 : i32, i32
  }
  func.func @transform_1(%arg0: i32, %arg1: memref<1xi32, #tpu.memory_space<smem>>) -> (i32, i32) {
    %c0_i32 = arith.constant 0 : i32
    %c0_i32_0 = arith.constant 0 : i32
    %c0_i32_1 = arith.constant 0 : i32
    return %c0_i32, %c0_i32_0 : i32, i32
  }
  func.func @transform_2(%arg0: i32, %arg1: memref<1xi32, #tpu.memory_space<smem>>) -> (i32, i32) {
    %c0_i32 = arith.constant 0 : i32
    %c0_i32_0 = arith.constant 0 : i32
    %c0_i32_1 = arith.constant 0 : i32
    return %c0_i32, %c0_i32_0 : i32, i32
  }
  func.func @transform_3(%arg0: i32, %arg1: memref<1xi32, #tpu.memory_space<smem>>) -> (i32, i32) {
    %c0_i32 = arith.constant 0 : i32
    %c0_i32_0 = arith.constant 0 : i32
    %c0_i32_1 = arith.constant 0 : i32
    return %c0_i32, %c0_i32_0 : i32, i32
  }
  func.func @transform_4(%arg0: i32, %arg1: memref<1xi32, #tpu.memory_space<smem>>) -> (i32, i32) {
    %c0_i32 = arith.constant 0 : i32
    %c0_i32_0 = arith.constant 0 : i32
    %c0_i32_1 = arith.constant 0 : i32
    return %c0_i32, %c0_i32_0 : i32, i32
  }
  func.func @transform_5(%arg0: i32, %arg1: memref<1xi32, #tpu.memory_space<smem>>) -> (i32, i32) {
    %c0_i32 = arith.constant 0 : i32
    %c0_i32_0 = arith.constant 0 : i32
    %c0_i32_1 = arith.constant 0 : i32
    return %c0_i32, %c0_i32_0 : i32, i32
  }
  func.func @transform_6(%arg0: i32, %arg1: memref<1xi32, #tpu.memory_space<smem>>) -> (i32, i32) {
    %c0_i32 = arith.constant 0 : i32
    %c0_i32_0 = arith.constant 0 : i32
    %c0_i32_1 = arith.constant 0 : i32
    return %c0_i32, %c0_i32_0 : i32, i32
  }
  func.func @transform_7(%arg0: i32, %arg1: memref<1xi32, #tpu.memory_space<smem>>) -> (i32, i32) {
    %c0_i32 = arith.constant 0 : i32
    %c0_i32_0 = arith.constant 0 : i32
    return %arg0, %c0_i32 : i32, i32
  }
}

</mosaic_0001>

<bundles_post_ra>
// kernel: tpu_custom_call.1
= control target key start
LH: loop header
LB: loop body
LE: loop exit
PB: predicated region body
PF: predicated region fallthrough
CT: control target
= control target key end

     0   :  { %14 = vsyncpa [#allocation5], 0  ;;  %s982_s0 = inlined_call_operand.<no memory space> [shape: s32[1], index: 0, kind: input, shape index: {}]   ;;  %s983_s1 = inlined_call_operand.hbm [shape: f32[16,128], index: 1, kind: input, shape index: {}]   ;;  %s984_s2 = inlined_call_operand.hbm [shape: bf16[128,128], index: 2, kind: input, shape index: {}]   ;;  %s985_s3 = inlined_call_operand.vmem [shape: f32[1,128], index: 3, kind: input, shape index: {}]   ;;  %s986_s4 = inlined_call_operand.hbm [shape: bf16[128,128], index: 4, kind: input, shape index: {}]   ;;  %s987_s5 = inlined_call_operand.vmem [shape: f32[1,128], index: 5, kind: input, shape index: {}]   ;;  %s988_s6 = inlined_call_operand.hbm [shape: bf16[128,128], index: 6, kind: input, shape index: {}]   ;;  %s989_s7 = inlined_call_operand.vmem [shape: f32[1,128], index: 7, kind: input, shape index: {}]   ;;  %s990_s8 = inlined_call_operand.hbm [shape: f32[16,128], index: 8, kind: output, shape index: {}]  }
   0x1   :  { %15 = vsyncpa [#allocation8], 0 }
   0x2   :  { %16 = vsyncpa [#allocation11], 0 }
   0x3   :  { %17 = vsyncpa [#allocation6], 0  ;;  %s844_s27 = smov [#allocation7]  }
   0x4   :  { %s35_s28 = sshll.u32 %s844_s27, 4  ;;  %s36_s28 = int_to_ptr.vmem [resolvable:$true] %s35_s28 }
   0x5   :  { %s744_s29 = scalar_lea.vmem %s36_s28, 1024  ;;  %p749_p1 = scmp.lt.s32.totalorder %s36_s28, %s36_s28 }
   0x6   :  { %p745_p0 = scmp.ne.s32.totalorder %s36_s28, %s744_s29  ;;  %p750_p2 = scmp.lt.s32.totalorder %s744_s29, %s744_s29 }
   0x8   :  { %p751_p3 = por %p750_p2, %p749_p1 }
   0xa   :  { %p752_p4 = pnand %p751_p3, %p745_p0 }
   0xc   :  { %755 = shalt.err (!%p752_p4)
}
   0xd   :  { %s845_s30 = smov 64   ;;  %s846_s9 = smov 4  }
   0xe   :  { %41 = dma.hbm_to_vmem [thread:$0]  %s984_s2, 1024, %s36_s28, [#allocation8], %s845_s30, %s845_s30, %s846_s9  }
   0xf   :  { %s847_s12 = smov [#allocation4]  }
  0x10   :  { %s23_s13 = sshll.u32 %s847_s12, 4  ;;  %s24_s13 = int_to_ptr.vmem [resolvable:$true] %s23_s13 }
  0x11   :  { %s764_s14 = scalar_lea.vmem %s24_s13, 256  ;;  %p769_p6 = scmp.lt.s32.totalorder %s24_s13, %s24_s13 }
  0x12   :  { %p765_p5 = scmp.ne.s32.totalorder %s24_s13, %s764_s14  ;;  %p770_p7 = scmp.lt.s32.totalorder %s764_s14, %s764_s14 }
  0x14   :  { %p771_p8 = por %p770_p7, %p769_p6 }
  0x16   :  { %p772_p9 = pnand %p771_p8, %p765_p5 }
  0x18   :  { %775 = shalt.err (!%p772_p9)
}
  0x19   :  { %s848_s15 = smov 128   ;;  %s849_s16 = smov 8  }
  0x1a   :  { %29 = dma.hbm_to_vmem [thread:$0]  %s983_s1, 256, %s24_s13, [#allocation5], %s848_s15, %s848_s15, %s849_s16  }
  0x1b   :  { %s850_s2 = smov [#allocation9]   ;;  %s851_s20 = smov [#allocation10]  }
  0x1c   :  { %s49_s19 = sshll.u32 %s850_s2, 4  ;;  %s63_s21 = sshll.u32 %s851_s20, 4  ;;  %s50_s19 = int_to_ptr.vmem [resolvable:$true] %s49_s19  ;;  %s64_s21 = int_to_ptr.vmem [resolvable:$true] %s63_s21 }
  0x1d   :  { %s784_s22 = scalar_lea.vmem %s50_s19, 1024  ;;  %p789_p11 = scmp.lt.s32.totalorder %s50_s19, %s50_s19 }
  0x1e   :  { %p785_p10 = scmp.ne.s32.totalorder %s50_s19, %s784_s22  ;;  %p790_p12 = scmp.lt.s32.totalorder %s784_s22, %s784_s22 }
  0x20   :  { %p791_p13 = por %p790_p12, %p789_p11 }
  0x22   :  { %p792_p0 = pnand %p791_p13, %p785_p10 }
  0x24   :  { %795 = shalt.err (!%p792_p0)
}
  0x25   :  { %55 = dma.hbm_to_vmem [thread:$0]  %s986_s4, 1024, %s50_s19, [#allocation8], %s845_s30, %s845_s30, %s846_s9  }
  0x26   :  { %s804_s1 = scalar_lea.vmem %s64_s21, 1024  ;;  %p809_p2 = scmp.lt.s32.totalorder %s64_s21, %s64_s21 }
  0x27   :  { %p805_p1 = scmp.ne.s32.totalorder %s64_s21, %s804_s1  ;;  %p810_p3 = scmp.lt.s32.totalorder %s804_s1, %s804_s1 }
  0x29   :  { %p811_p4 = por %p810_p3, %p809_p2 }
  0x2b   :  { %p812_p5 = pnand %p811_p4, %p805_p1 }
  0x2d   :  { %815 = shalt.err (!%p812_p5)
}
  0x2e   :  { %69 = dma.hbm_to_vmem [thread:$0]  %s988_s6, 1024, %s64_s21, [#allocation11], %s845_s30, %s845_s30, %s846_s9  }
  0x2f   :  { %836 = dma.done.wait [#allocation5], 256  }
  0x30   :  { %837 = vsyncadd [#allocation5], 4294967040 }
  0x31   :  { %838 = dma.done.wait [#allocation8], 2048  }
  0x32   :  { %839 = vsyncadd [#allocation8], 4294965248 }
  0x33   :  { %840 = dma.done.wait [#allocation11], 1024  }
  0x34   :  { %841 = vsyncadd [#allocation11], 4294966272  ;;  %v89_v0 = vlaneseq  ;;  %v852_v1 = vmov 0.0   ;;  %vm853_vm0 = vmmov 0   ;;  %s102_s27 = smul.u32 668265263, %s982_s0 }
  0x35   :  { %641 = vmatprep.subr.bf16.mxu0 %v852_v1  ;;  %657 = vmatprep.mubr.msk.bf16.mxu0 %vm853_vm0, %v852_v1  ;;  %v712_v8 = vld [vmem:[#allocation7 + $0x38] sm:$0xff]   ;;  %v713_v12 = vld [vmem:[#allocation7 + $0x30] sm:$0xff]   ;;  %v714_v15 = vld [vmem:[#allocation7 + $0x28] sm:$0xff]  }
  0x36   :  { %v90_v2 = vshrl.u32 %v89_v0, 7  ;;  %v96_v3 = vand.u32 127, %v89_v0  ;;  %661 = vmatprep.subr.bf16.mxu1 %v852_v1  ;;  %677 = vmatprep.mubr.msk.bf16.mxu1 %vm853_vm0, %v852_v1  ;;  %v103_v11 = vstv %s102_s27  ;;  %v715_v16 = vld [vmem:[#allocation7 + $0x20] sm:$0xff]   ;;  %v720_v19 = vld [vmem:[#allocation9 + $0x38] sm:$0xff]   ;;  %v721_v22 = vld [vmem:[#allocation9 + $0x30] sm:$0xff]  }
  0x37   :  { %642 = vmatpush3.bf16.msra.mxu0 %v712_v8  ;;  %662 = vmatpush3.bf16.msra.mxu1 %v720_v19  ;;  %v716_v25 = vld [vmem:[#allocation7 + $0x18] sm:$0xff]   ;;  %v722_v28 = vld [vmem:[#allocation9 + $0x28] sm:$0xff]   ;;  %v717_v29 = vld [vmem:[#allocation7 + $0x10] sm:$0xff]  }
  0x38   :  { %v91_v4 = vadd.s32 8, %v90_v2  ;;  %v97_v5 = vmul.u32 16777619, %v90_v2  ;;  %v99_v6 = vmul.u32 1664525, %v96_v3  ;;  %643 = vmatprep.subr.bf16.mxu0 %v852_v1  ;;  %663 = vmatprep.subr.bf16.mxu1 %v852_v1  ;;  %v723_v32 = vld [vmem:[#allocation9 + $0x20] sm:$0xff]  }
  0x39   :  { %v718_v35 = vld [vmem:[#allocation7 + $0x8] sm:$0xff]   ;;  %v724_v38 = vld [vmem:[#allocation9 + $0x18] sm:$0xff]   ;;  %v719_v43 = vld [vmem:[#allocation7] sm:$0xff]  }
  0x3a   :  { %v98_v7 = vmul.u32 16777619, %v91_v4  ;;  %v100_v9 = vadd.s32 %v99_v6, %v97_v5  ;;  %v87_v44 = vld [vmem:[#allocation4] sm:$0xff]  ;;  %v88_v45 = vld [vmem:[#allocation4 + $0x8] sm:$0xff]  ;;  %v726_v50 = vld [vmem:[#allocation9 + $0x8] sm:$0xff]  }
  0x3b   :  { %644 = vmatpush3.bf16.msra.mxu0 %v713_v12  ;;  %664 = vmatpush3.bf16.msra.mxu1 %v721_v22  ;;  %v576_v48 = vpack.c.bf16 %v88_v45, %v87_v44  ;;  %v725_v49 = vld [vmem:[#allocation9 + $0x10] sm:$0xff]   ;;  %v727_v51 = vld [vmem:[#allocation9] sm:$0xff]   ;;  %v728_v52 = vld [vmem:[#allocation10 + $0x38] sm:$0xff]  }
  0x3c   :  { %v101_v10 = vadd.s32 %v99_v6, %v98_v7  ;;  %v934_v13 = vadd.s32 %v103_v11, %v100_v9  ;;  %645 = vmatprep.subr.bf16.mxu0 %v852_v1  ;;  %665 = vmatprep.subr.bf16.mxu1 %v852_v1  ;;  %v729_v53 = vld [vmem:[#allocation10 + $0x30] sm:$0xff]   ;;  %v730_v54 = vld [vmem:[#allocation10 + $0x28] sm:$0xff]   ;;  %v731_v55 = vld [vmem:[#allocation10 + $0x20] sm:$0xff]  }
  0x3d   :  { %v732_v56 = vld [vmem:[#allocation10 + $0x18] sm:$0xff]   ;;  %v566_v12 = vld [vmem:[%s985_s3] ss:$0 sm:$0xff] }
  0x3e   :  { %v936_v14 = vadd.s32 %v103_v11, %v101_v10  ;;  %v106_v17 = vadd.s32 889516851, %v934_v13  ;;  %v251_v57 = vadd.s32 1779033702, %v934_v13 }
  0x3f   :  { %646 = vmatpush3.bf16.msra.mxu0 %v714_v15  ;;  %666 = vmatpush3.bf16.msra.mxu1 %v722_v28  ;;  %v735_v28 = vld [vmem:[#allocation10] sm:$0xff]  }
  0x40   :  { %v107_v18 = vadd.s32 889516851, %v936_v14  ;;  %v560_v20 = vshrl.u32 %v106_v17, 16  ;;  %647 = vmatprep.subr.bf16.mxu0 %v852_v1  ;;  %667 = vmatprep.subr.bf16.mxu1 %v852_v1  ;;  %v252_v58 = vadd.s32 1779033702, %v936_v14  ;;  %v578_v59 = vshrl.u32 %v251_v57, 16 }
  0x42   :  { %v561_v21 = vshrl.u32 %v107_v18, 16  ;;  %v112_v23 = vxor.u32 %v560_v20, %v106_v17  ;;  %v579_v60 = vshrl.u32 %v252_v58, 16  ;;  %v257_v61 = vxor.u32 %v578_v59, %v251_v57 }
  0x43   :  { %648 = vmatpush3.bf16.msra.mxu0 %v715_v16  ;;  %668 = vmatpush3.bf16.msra.mxu1 %v723_v32 }
  0x44   :  { %v113_v24 = vxor.u32 %v561_v21, %v107_v18  ;;  %v114_v26 = vmul.u32 73244475, %v112_v23  ;;  %649 = vmatprep.subr.bf16.mxu0 %v852_v1  ;;  %669 = vmatprep.subr.bf16.mxu1 %v852_v1  ;;  %v258_v62 = vxor.u32 %v579_v60, %v252_v58  ;;  %v259_v63 = vmul.u32 73244475, %v257_v61 }
  0x46   :  { %v115_v27 = vmul.u32 73244475, %v113_v24  ;;  %v562_v30 = vshrl.u32 %v114_v26, 16  ;;  %v260_v0 = vmul.u32 73244475, %v258_v62  ;;  %v580_v2 = vshrl.u32 %v259_v63, 16 }
  0x47   :  { %650 = vmatpush3.bf16.msra.mxu0 %v716_v25  ;;  %670 = vmatpush3.bf16.msra.mxu1 %v724_v38 }
  0x48   :  { %v563_v31 = vshrl.u32 %v115_v27, 16  ;;  %v120_v33 = vxor.u32 %v562_v30, %v114_v26  ;;  %651 = vmatprep.subr.bf16.mxu0 %v852_v1  ;;  %671 = vmatprep.subr.bf16.mxu1 %v852_v1  ;;  %v581_v3 = vshrl.u32 %v260_v0, 16  ;;  %v265_v4 = vxor.u32 %v580_v2, %v259_v63  ;;  %v733_v26 = vld [vmem:[#allocation10 + $0x10] sm:$0xff]  }
  0x49   :  { %v397_v30 = vadd.s32 2668550553, %v936_v14 }
  0x4a   :  { %v121_v34 = vxor.u32 %v563_v31, %v115_v27  ;;  %v122_v36 = vmul.u32 73244475, %v120_v33  ;;  %v266_v5 = vxor.u32 %v581_v3, %v260_v0  ;;  %v267_v6 = vmul.u32 73244475, %v265_v4  ;;  %v734_v27 = vld [vmem:[#allocation10 + $0x8] sm:$0xff]  }
  0x4b   :  { %652 = vmatpush3.bf16.msra.mxu0 %v717_v29  ;;  %672 = vmatpush3.bf16.msra.mxu1 %v725_v49  ;;  %v396_v29 = vadd.s32 2668550553, %v934_v13  ;;  %v597_v32 = vshrl.u32 %v397_v30, 16  ;;  %v584_v13 = vld [vmem:[%s987_s5] ss:$0 sm:$0xff]  ;;  %s854_s5 = smov [#allocation12]  }
  0x4c   :  { %v123_v37 = vmul.u32 73244475, %v121_v34  ;;  %v564_v39 = vshrl.u32 %v122_v36, 16  ;;  %653 = vmatprep.subr.bf16.mxu0 %v852_v1  ;;  %673 = vmatprep.subr.bf16.mxu1 %v852_v1  ;;  %v268_v7 = vmul.u32 73244475, %v266_v5  ;;  %v582_v8 = vshrl.u32 %v267_v6, 16 }
  0x4d   :  { %v596_v31 = vshrl.u32 %v396_v29, 16  ;;  %v403_v34 = vxor.u32 %v597_v32, %v397_v30  ;;  %s546_s10 = sshll.u32 %s854_s5, 4  ;;  %s547_s10 = int_to_ptr.vmem [resolvable:$true] %s546_s10 }
  0x4e   :  { %v565_v40 = vshrl.u32 %v123_v37, 16  ;;  %v128_v41 = vxor.u32 %v564_v39, %v122_v36  ;;  %v583_v9 = vshrl.u32 %v268_v7, 16  ;;  %v273_v10 = vxor.u32 %v582_v8, %v267_v6  ;;  %s816_s11 = scalar_lea.vmem %s547_s10, 256  ;;  %p821_p7 = scmp.lt.s32.totalorder %s547_s10, %s547_s10 }
  0x4f   :  { %654 = vmatpush3.bf16.msra.mxu0 %v718_v35  ;;  %674 = vmatpush3.bf16.msra.mxu1 %v726_v50  ;;  %v402_v33 = vxor.u32 %v596_v31, %v396_v29  ;;  %v405_v36 = vmul.u32 73244475, %v403_v34  ;;  %p817_p6 = scmp.ne.s32.totalorder %s547_s10, %s816_s11  ;;  %p822_p8 = scmp.lt.s32.totalorder %s816_s11, %s816_s11 }
  0x50   :  { %v129_v42 = vxor.u32 %v565_v40, %v123_v37  ;;  %v130_v46 = vand.u32 2147483647, %v128_v41  ;;  %655 = vmatprep.subr.bf16.mxu0 %v852_v1  ;;  %675 = vmatprep.subr.bf16.mxu1 %v852_v1  ;;  %v274_v11 = vxor.u32 %v583_v9, %v268_v7  ;;  %v275_v16 = vand.u32 2147483647, %v273_v10 }
  0x51   :  { %v404_v35 = vmul.u32 73244475, %v402_v33  ;;  %v599_v38 = vshrl.u32 %v405_v36, 16  ;;  %p823_p9 = por %p822_p8, %p821_p7 }
  0x52   :  { %v131_v47 = vand.u32 2147483647, %v129_v42  ;;  %vm132_vm1 = vcmp.ge.s32.totalorder %v130_v46, 429496730  ;;  %v276_v17 = vand.u32 2147483647, %v274_v11 }
  0x53   :  { %656 = vmatpush3.bf16.msra.mxu0 %v719_v43  ;;  %676 = vmatpush3.bf16.msra.mxu1 %v727_v51  ;;  %vm277_vm4 = vcmp.ge.s32.totalorder %v275_v16, 429496730  ;;  %v598_v37 = vshrl.u32 %v404_v35, 16  ;;  %v411_v40 = vxor.u32 %v599_v38, %v405_v36  ;;  %p824_p10 = pnand %p823_p9, %p817_p6 }
  0x54   :  { %vm133_vm2 = vcmp.ge.s32.totalorder %v131_v47, 429496730  ;;  %681 = vmatprep.subr.bf16.mxu0 %v852_v1  ;;  %vm278_vm5 = vcmp.ge.s32.totalorder %v276_v17, 429496730 }
  0x55   :  { %vm575_vm3 = vmpackc.low %vm133_vm2, %vm132_vm1  ;;  %v410_v39 = vxor.u32 %v598_v37, %v404_v35  ;;  %v413_v42 = vmul.u32 73244475, %v411_v40 }
  0x56   :  { %658 = vmatmul.mubr.msk.bf16.vlgmr.msra.gmra.mxu0 %vm575_vm3, %v576_v48  ;;  %vm593_vm6 = vmpackc.low %vm278_vm5, %vm277_vm4 }
  0x57   :  { %697 = vmatprep.mubr.msk.bf16.mxu0 %vm853_vm0, %v852_v1  ;;  %682 = vmatpush3.bf16.msra.mxu0 %v728_v52  ;;  %v412_v41 = vmul.u32 73244475, %v410_v39 }
  0x58   :  { %683 = vmatprep.subr.bf16.mxu0 %v852_v1 }
  0x59   :  { %v600_v43 = vshrl.u32 %v412_v41, 16 }
  0x5b   :  { %684 = vmatpush3.bf16.msra.mxu0 %v729_v53  ;;  %v418_v44 = vxor.u32 %v600_v43, %v412_v41 }
  0x5c   :  { %685 = vmatprep.subr.bf16.mxu0 %v852_v1 }
  0x5d   :  { %v420_v46 = vand.u32 2147483647, %v418_v44 }
  0x5f   :  { %686 = vmatpush3.bf16.msra.mxu0 %v730_v54  ;;  %vm422_vm7 = vcmp.ge.s32.totalorder %v420_v46, 429496730 }
  0x60   :  { %687 = vmatprep.subr.bf16.mxu0 %v852_v1 }
  0x63   :  { %688 = vmatpush3.bf16.msra.mxu0 %v731_v55 }
  0x64   :  { %689 = vmatprep.subr.bf16.mxu0 %v852_v1 }
  0x67   :  { %690 = vmatpush3.bf16.msra.mxu0 %v732_v56  ;;  %v602_v56 = vld [vmem:[%s989_s7] ss:$0 sm:$0xff] }
  0x68   :  { %691 = vmatprep.subr.bf16.mxu0 %v852_v1 }
  0x6b   :  { %692 = vmatpush3.bf16.msra.mxu0 %v733_v26 }
  0x6c   :  { %693 = vmatprep.subr.bf16.mxu0 %v852_v1 }
  0x6f   :  { %694 = vmatpush3.bf16.msra.mxu0 %v734_v27 }
  0x70   :  { %695 = vmatprep.subr.bf16.mxu0 %v852_v1  ;;  %v601_v1 = vshrl.u32 %v413_v42, 16 }
  0x72   :  { %v419_v45 = vxor.u32 %v601_v1, %v413_v42 }
  0x73   :  { %696 = vmatpush3.bf16.msra.mxu0 %v735_v28 }
  0x74   :  { %v421_v47 = vand.u32 2147483647, %v419_v45 }
  0x76   :  { %vm423_vm8 = vcmp.ge.s32.totalorder %v421_v47, 429496730 }
  0x77   :  { %vm611_vm9 = vmpackc.low %vm423_vm8, %vm422_vm7 }
 0x116   :  { %v242_v15 = vpop.f32.mrf.mxu0 }
 0x117   :  { %v243_v19 = vadd.f32 %v566_v12, %v242_v15 }
 0x118   :  { %v659_v18 = vpop.f32.mrf.mxu0 }
 0x119   :  { %v249_v23 = vmax.f32 %v243_v19, 0.0 }
 0x11a   :  { %v245_v20 = vpop.f32.mrf.mxu0 }
 0x11b   :  { %v246_v21 = vadd.f32 %v566_v12, %v245_v20 }
 0x11c   :  { %v660_v22 = vpop.f32.mrf.mxu0 }
 0x11d   :  { %v250_v24 = vmax.f32 %v246_v21, 0.0 }
 0x11f   :  { %v594_v25 = vpack.c.bf16 %v250_v24, %v249_v23 }
 0x121   :  { %678 = vmatmul.mubr.msk.bf16.vlgmr.msra.gmra.mxu1 %vm593_vm6, %v594_v25 }
 0x1e1   :  { %v387_v14 = vpop.f32.mrf.mxu1 }
 0x1e2   :  { %v388_v49 = vadd.f32 %v584_v13, %v387_v14 }
 0x1e3   :  { %v679_v48 = vpop.f32.mrf.mxu1 }
 0x1e4   :  { %v394_v53 = vmax.f32 %v388_v49, 0.0 }
 0x1e5   :  { %v390_v50 = vpop.f32.mrf.mxu1 }
 0x1e6   :  { %v391_v51 = vadd.f32 %v584_v13, %v390_v50 }
 0x1e7   :  { %v680_v52 = vpop.f32.mrf.mxu1 }
 0x1e8   :  { %v395_v54 = vmax.f32 %v391_v51, 0.0 }
 0x1ea   :  { %v612_v55 = vpack.c.bf16 %v395_v54, %v394_v53 }
 0x1ec   :  { %698 = vmatmul.mubr.msk.bf16.vlgmr.msra.gmra.mxu0 %vm611_vm9, %v612_v55 }
 0x2ac   :  { %v532_v57 = vpop.f32.mrf.mxu0 }
 0x2ad   :  { %v533_v58 = vadd.f32 %v602_v56, %v532_v57 }
 0x2ae   :  { %v699_v59 = vpop.f32.mrf.mxu0 }
 0x2af   :  { %539 = vst [vmem:[#allocation12] sm:$0xff] %v533_v58 }
 0x2b0   :  { %v535_v60 = vpop.f32.mrf.mxu0 }
 0x2b1   :  { %v536_v61 = vadd.f32 %v602_v56, %v535_v60 }
 0x2b2   :  { %v700_v62 = vpop.f32.mrf.mxu0 }
 0x2b3   :  { %540 = vst [vmem:[#allocation12 + $0x8] sm:$0xff] %v536_v61 }
 0x2b4   :  { %827 = shalt.err (!%p824_p10)
}
 0x2b5   :  { %552 = dma.vmem_to_hbm [thread:$0]  %s547_s10, 256, %s990_s8, [#allocation6], %s848_s15, %s848_s15, %s849_s16  }
 0x2b6   :  { %842 = dma.done.wait [#allocation6], 256  }
 0x2b7   :  { %843 = vsyncadd [#allocation6], 4294967040 }
 0x2b8   :  { %556 = vsyncpa [#allocation5], 1 }
 0x2b9   :  { %557 = vsyncpa [#allocation8], 1 }
 0x2ba   :  { %558 = vsyncpa [#allocation11], 1 }
 0x2bb   :  { %559 = vsyncpa [#allocation6], 1 }

</bundles_post_ra>
